<compile_context>
chip_gen: v5e
topology: v5e:2x2
jax: 0.10.0
libtpu: 0.0.40
codegen_flags: <defaults>
</compile_context>

<pallas_src>
import jax
import jax.numpy as jnp
from jax.experimental import pallas as pl
from jax.experimental.pallas import tpu as pltpu

_LANES = 128
_SUBLANES = 8


# ------------------------------- Pallas kernel ------------------------------ #

def _recon_kernel(p_ref, r_ref, f_ref, n_ref, o_ref):
    """Fully fused Recon forward on one [tile_rows, 128] tile (VPU + EUP only)."""
    de = p_ref[0]
    la = p_ref[1]
    ga = p_ref[2]

    r = r_ref[...]
    f = f_ref[...]
    n = n_ref[...]

    r2 = r * r
    f2 = f * f
    n2 = n * n

    denom = r2 * r2 + jnp.float32(0.001)          # (_recon**2)**2 + 0.001
    val = r2 - de * (la * (r2 - n2) / denom + ga * (r2 - f2))
    o_ref[...] = jnp.sqrt(val).astype(o_ref.dtype)


# --------------------------------- wrapper ---------------------------------- #

def _choose_tile_rows(rows):
    """Pick a (8,128)-legal tile that is big, but leaves >=2 grid steps when possible."""
    if rows <= _SUBLANES:
        return rows                                # single full block (legal: full extent)
    tr = rows - rows % _SUBLANES
    tr = min(512, tr)
    if tr >= rows:
        # whole array in one block -> split so both v7x TensorCores get work
        half = (rows // 2) - ((rows // 2) % _SUBLANES)
        tr = max(_SUBLANES, half)
    return tr


def recon_forward(recon, feature, noise, params):
    """params = jnp.array([de, la, ga], float32); inputs: any (same) shape."""
    orig_shape = recon.shape
    orig_dtype = recon.dtype
    total = recon.size

    rows = pl.cdiv(total, _LANES)
    tile_rows = _choose_tile_rows(rows)
    rows_padded = pl.cdiv(rows, tile_rows) * tile_rows
    padded = rows_padded * _LANES

    def to2d(a):
        flat = a.reshape(-1).astype(jnp.float32)
        flat = jnp.pad(flat, (0, padded - total))
        return flat.reshape(rows_padded, _LANES)

    r2d, f2d, n2d = to2d(recon), to2d(feature), to2d(noise)

    tile_spec = pl.BlockSpec((tile_rows, _LANES), lambda i: (i, 0))
    out = pl.pallas_call(
        _recon_kernel,
        out_shape=jax.ShapeDtypeStruct((rows_padded, _LANES), jnp.float32),
        grid=(rows_padded // tile_rows,),
        in_specs=[
            pl.BlockSpec(memory_space=pltpu.MemorySpace.SMEM),   # (de, la, ga) scalars
            tile_spec, tile_spec, tile_spec,
        ],
        out_specs=tile_spec,
        compiler_params=pltpu.CompilerParams(
            dimension_semantics=("parallel",)),
    )(params.astype(jnp.float32), r2d, f2d, n2d)

    return out.reshape(-1)[:total].reshape(orig_shape).astype(orig_dtype)


# ---------------------- plain-JAX reference (for checking) ------------------ #

def reference_forward(recon, feature, noise, de, la, ga):
    r2 = recon.astype(jnp.float32) ** 2
    f2 = feature.astype(jnp.float32) ** 2
    n2 = noise.astype(jnp.float32) ** 2
    val = r2 - de * (la * (r2 - n2) / (r2 * r2 + 0.001) + ga * (r2 - f2))
    return jnp.sqrt(val)


# ------------------------------------ main ----------------------------------- #

if __name__ == "__main__":
    key = jax.random.PRNGKey(0)
    kr, kf, kn = jax.random.split(key, 3)
    shape = (2, 4, 16, 16)

    recon_in = jax.random.normal(kr, shape, jnp.float32)
    feature_in = jax.random.normal(kf, shape, jnp.float32)
    noise_in = jax.random.normal(kn, shape, jnp.float32)

    de, la, ga = 0.001, 0.55, 1.0           # module defaults (de/ga frozen, la learnable)
    params = jnp.array([de, la, ga], jnp.float32)

    fwd = jax.jit(recon_forward)
    out = fwd(recon_in, feature_in, noise_in, params)
    jax.block_until_ready(out)

    ref = reference_forward(recon_in, feature_in, noise_in, de, la, ga)
    err = float(jnp.max(jnp.abs(out - ref)) / (jnp.max(jnp.abs(ref)) + 1e-6))
    assert out.shape == shape, (out.shape, shape)
    assert err < 1e-4, f"mismatch vs reference, normalized max err = {err}"

    print("KERNEL_OK")
</pallas_src>

<mosaic_0001>
module attributes {stable_mosaic.version = 11 : i64} {
  func.func @_recon_kernel(%arg0: i32, %arg1: memref<3xf32, #tpu.memory_space<smem>>, %arg2: memref<8x128xf32, #tpu.memory_space<vmem>>, %arg3: memref<8x128xf32, #tpu.memory_space<vmem>>, %arg4: memref<8x128xf32, #tpu.memory_space<vmem>>, %arg5: memref<8x128xf32, #tpu.memory_space<vmem>>) attributes {dimension_semantics = [#tpu.dimension_semantics<parallel>], iteration_bounds = array<i64: 2>, scalar_prefetch = 0 : i64, scratch_operands = 0 : i64, tpu.core_type = #tpu.core_type<tc>, window_params = [{transform_indices = @transform_0, window_bounds = array<i64: 3>}, {transform_indices = @transform_1, window_bounds = array<i64: 8, 128>}, {transform_indices = @transform_2, window_bounds = array<i64: 8, 128>}, {transform_indices = @transform_3, window_bounds = array<i64: 8, 128>}, {transform_indices = @transform_4, window_bounds = array<i64: 8, 128>}]} {
    %c0 = arith.constant 0 : index
    %0 = memref.load %arg1[%c0] : memref<3xf32, #tpu.memory_space<smem>>
    %c1 = arith.constant 1 : index
    %1 = memref.load %arg1[%c1] : memref<3xf32, #tpu.memory_space<smem>>
    %c2 = arith.constant 2 : index
    %2 = memref.load %arg1[%c2] : memref<3xf32, #tpu.memory_space<smem>>
    %c0_0 = arith.constant 0 : index
    %c0_1 = arith.constant 0 : index
    %3 = vector.load %arg2[%c0_0, %c0_1] : memref<8x128xf32, #tpu.memory_space<vmem>>, vector<8x128xf32>
    %c0_2 = arith.constant 0 : index
    %c0_3 = arith.constant 0 : index
    %4 = vector.load %arg3[%c0_2, %c0_3] : memref<8x128xf32, #tpu.memory_space<vmem>>, vector<8x128xf32>
    %c0_4 = arith.constant 0 : index
    %c0_5 = arith.constant 0 : index
    %5 = vector.load %arg4[%c0_4, %c0_5] : memref<8x128xf32, #tpu.memory_space<vmem>>, vector<8x128xf32>
    %6 = arith.mulf %3, %3 : vector<8x128xf32>
    %7 = arith.mulf %4, %4 : vector<8x128xf32>
    %8 = arith.mulf %5, %5 : vector<8x128xf32>
    %9 = arith.mulf %6, %6 : vector<8x128xf32>
    %cst = arith.constant 1.000000e-03 : f32
    %10 = vector.broadcast %cst : f32 to vector<8x128xf32>
    %11 = arith.addf %9, %10 : vector<8x128xf32>
    %12 = arith.subf %6, %8 : vector<8x128xf32>
    %13 = vector.broadcast %1 : f32 to vector<8x128xf32>
    %14 = arith.mulf %13, %12 : vector<8x128xf32>
    %15 = arith.divf %14, %11 : vector<8x128xf32>
    %16 = arith.subf %6, %7 : vector<8x128xf32>
    %17 = vector.broadcast %2 : f32 to vector<8x128xf32>
    %18 = arith.mulf %17, %16 : vector<8x128xf32>
    %19 = arith.addf %15, %18 : vector<8x128xf32>
    %20 = vector.broadcast %0 : f32 to vector<8x128xf32>
    %21 = arith.mulf %20, %19 : vector<8x128xf32>
    %22 = arith.subf %6, %21 : vector<8x128xf32>
    %23 = math.sqrt %22 : vector<8x128xf32>
    %c0_6 = arith.constant 0 : index
    %c0_7 = arith.constant 0 : index
    %24 = vector.load %arg5[%c0_6, %c0_7] : memref<8x128xf32, #tpu.memory_space<vmem>>, vector<8x128xf32>
    tpu.vector_store %arg5[%c0_6, %c0_7], %23 {strides = array<i32>} : memref<8x128xf32, #tpu.memory_space<vmem>>, vector<8x128xf32>,
    return
  }
  func.func @transform_0(%arg0: i32) -> i32 {
    %c0_i32 = arith.constant 0 : i32
    %c0_i32_0 = arith.constant 0 : i32
    return %c0_i32 : i32
  }
  func.func @transform_1(%arg0: i32) -> (i32, i32) {
    %c0_i32 = arith.constant 0 : i32
    %c0_i32_0 = arith.constant 0 : i32
    return %arg0, %c0_i32 : i32, i32
  }
  func.func @transform_2(%arg0: i32) -> (i32, i32) {
    %c0_i32 = arith.constant 0 : i32
    %c0_i32_0 = arith.constant 0 : i32
    return %arg0, %c0_i32 : i32, i32
  }
  func.func @transform_3(%arg0: i32) -> (i32, i32) {
    %c0_i32 = arith.constant 0 : i32
    %c0_i32_0 = arith.constant 0 : i32
    return %arg0, %c0_i32 : i32, i32
  }
  func.func @transform_4(%arg0: i32) -> (i32, i32) {
    %c0_i32 = arith.constant 0 : i32
    %c0_i32_0 = arith.constant 0 : i32
    return %arg0, %c0_i32 : i32, i32
  }
}

</mosaic_0001>

<bundles_post_ra>
// kernel: recon_forward.1
= control target key start
LH: loop header
LB: loop body
LE: loop exit
PB: predicated region body
PF: predicated region fallthrough
CT: control target
= control target key end

     0   :  { %9 = vsyncpa [#allocation3], 0  ;;  %s470_s15 = smov 0   ;;  %s502_s0 = inlined_call_operand.vmem [shape: f32[3], index: 0, kind: input, shape index: {}]   ;;  %s503_s1 = inlined_call_operand.vmem [shape: f32[16,128], index: 1, kind: input, shape index: {}]   ;;  %s504_s2 = inlined_call_operand.vmem [shape: f32[16,128], index: 2, kind: input, shape index: {}]   ;;  %s505_s3 = inlined_call_operand.vmem [shape: f32[16,128], index: 3, kind: input, shape index: {}]   ;;  %s506_s4 = inlined_call_operand.vmem [shape: f32[16,128], index: 4, kind: output, shape index: {}]  }
   0x1 LB: > { %s379_s16 = sadd.s32 4294967295, %s442_s15   ;;  %p381_p0 = scmp.ge.s32.totalorder %s442_s15, 1  ;;  %s442_s15 = sphi %s470_s15, %s15_s15  }
   0x2   : > { %p145_p1 = scmp.lt.s32.totalorder %s442_s15, 3  ;;  %s157_s19 = sshll.u32 %s502_s0, 4  ;;  %s158_s19 = int_to_ptr.vmem [resolvable:$true] %s157_s19 }
   0x3   : > { %p402_p3 = scmp.eq.s32.totalorder %s379_s16, 0  ;;  %s444_s20 = smov [#allocation2]  }
   0x4   : > { %p146_p2 = pnand %p381_p0, %p145_p1 }
   0x6   : > { %p398_p4 = pneg %p146_p2  ;;  %191 = sbr.rel (%p146_p2) target bundleno = 73 (0x49), region = 36 }
   0x8   : > { %p399_p5 = pnand %p402_p3, %p398_p4 }
   0xa   : > { %401 = dma.vmem_to_smem (!%p399_p5), %s158_s19, 16, %s444_s20, [#allocation3]  }
   0xb   : > { %437 = dma.done.wait (%p402_p3), [#allocation3], 16  }
   0xc   : > { %439 = vsyncadd (%p402_p3), [#allocation3], 4294967280 }
   0xd   : > { %198 = sfence }
   0xe   : > { %p225_p6 = scmp.lt.s32.totalorder %s379_s16, 1  ;;  %s390_s5 = sld [smem:[#allocation2 + $0x1]] }
   0xf   : > { %s391_s6 = sld [smem:[#allocation2 + $0x2]] }
  0x10   : > { %s508_s16 = smov (!%p225_p6, %s379_s16), 1  ;;  %s241_s7 = sld [smem:[#allocation2]] }
  0x11   : > { %s481_s21 = sshll.u32 %s508_s16, 3 }
  0x12   : > { %s228_s24 = scalar_lea.vmem %s503_s1, %s481_s21  ;;  %s236_s27 = scalar_lea.vmem %s505_s3, %s481_s21 }
  0x13   : > { %v244_v0 = vld [vmem:[%s228_s24] sm:$0xff]  ;;  %s232_s30 = scalar_lea.vmem %s504_s2, %s481_s21  ;;  %s240_s10 = scalar_lea.vmem %s506_s4, %s481_s21 }
  0x14   : > { %v247_v1 = vmul.f32 %v244_v0, %v244_v0  ;;  %v246_v4 = vld [vmem:[%s236_s27] sm:$0xff]  ;;  %v253_v14 = vstv %s390_s5 }
  0x15   : > { %v245_v5 = vld [vmem:[%s232_s30] sm:$0xff]  ;;  %v249_v6 = vmul.f32 %v246_v4, %v246_v4  ;;  %v271_v18 = vstv %s391_s6 }
  0x16   : > { %v250_v2 = vmul.f32 %v247_v1, %v247_v1  ;;  %v248_v8 = vmul.f32 %v245_v5, %v245_v5  ;;  %v274_v25 = vstv %s241_s7 }
  0x17   : > { %v252_v10 = vsub.f32 %v247_v1, %v249_v6 }
  0x18   : > { %v251_v3 = vadd.f32 0.001, %v250_v2  ;;  %v270_v16 = vsub.f32 %v247_v1, %v248_v8 }
  0x19   : > { %v254_v19 = vmul.f32 %v253_v14, %v252_v10 }
  0x1a   : > { %413 = vrcp.f32 %v251_v3  ;;  %v266_v11 = vand.u32 2147483648, %v251_v3  ;;  %vm260_vm0 = vweird.f32 %v251_v3  ;;  %v264_v13 = vand.u32 2147483647, %v251_v3 }
  0x1b   : > { %v272_v22 = vmul.f32 %v271_v18, %v270_v16 }
  0x1c   : > { %v267_v17 = vor.u32 1.1754944e-38, %v266_v11  ;;  %vm265_vm3 = vcmp.eq.f32.partialorder %v264_v13, 8.507059e+37 }
  0x20   : > { %v414_v7 = vpop.eup %413 }
  0x21   : > { %v256_v9 = vmul.f32 %v414_v7, %v251_v3  ;;  %vm261_vm1 = vweird.f32 %v414_v7 }
  0x22   : > { %vm262_vm2 = vmor %vm260_vm0, %vm261_vm1 }
  0x23   : > { %v257_v12 = vsub.f32 1.0, %v256_v9 }
  0x25   : > { %v258_v15 = vmul.f32 %v414_v7, %v257_v12 }
  0x27   : > { %v259_v20 = vadd.f32 %v414_v7, %v258_v15 }
  0x29   : > { %v263_v21 = vsel %vm262_vm2, %v414_v7, %v259_v20 }
  0x2a   : > { %v268_v23 = vsel %vm265_vm3, %v267_v17, %v263_v21 }
  0x2b   : > { %v269_v24 = vmul.f32 %v268_v23, %v254_v19 }
  0x2d   : > { %v273_v26 = vadd.f32 %v272_v22, %v269_v24 }
  0x2f   : > { %v275_v27 = vmul.f32 %v274_v25, %v273_v26 }
  0x31   : > { %v276_v28 = vsub.f32 %v247_v1, %v275_v27 }
  0x33   : > { %415 = vrsqrt.f32 %v276_v28  ;;  %vm284_vm4 = vcmp.eq.f32.partialorder %v276_v28, inf  ;;  %v287_v35 = vand.u32 2147483648, %v276_v28  ;;  %vm286_vm5 = vcmp.eq.f32.partialorder %v276_v28, 0.0 }
  0x39   : > { %v416_v29 = vpop.eup %415 }
  0x3a   : > { %v278_v30 = vmul.f32 %v416_v29, %v276_v28 }
  0x3c   : > { %v279_v31 = vmul.f32 %v416_v29, %v278_v30 }
  0x3e   : > { %v280_v32 = vmul.f32 0.5, %v279_v31 }
  0x40   : > { %v281_v33 = vsub.f32 1.5, %v280_v32 }
  0x42   : > { %v282_v34 = vmul.f32 %v416_v29, %v281_v33 }
  0x44   : > { %v283_v36 = vmul.f32 %v282_v34, %v276_v28 }
  0x46   : > { %v285_v37 = vsel %vm284_vm4, %v276_v28, %v283_v36 }
  0x47   : > { %v288_v38 = vsel %vm286_vm5, %v287_v35, %v285_v37 }
  0x48   : > { %289 = vst [vmem:[%s240_s10] sm:$0xff] %v288_v38 }
  0x49 PF: > { %s15_s15 = sadd.s32 1, %s442_s15  }
  0x4a   : > { %p12_p7 = scmp.ge.s32.totalorder %s15_s15, 4  }
  0x4c   :  { %14 = sbr.rel (!%p12_p7) target bundleno = 1 (0x1), region = 77 }
  0x51   :  { %309 = vsyncpa [#allocation3], 1 }
  0x52   :  { %311 = vsyncpa [#allocation3 + $0x1], 1 }

</bundles_post_ra>
